<compile_context>
chip_gen: v5e
topology: v5e:2x2
jax: 0.10.0
libtpu: 0.0.40
codegen_flags: <defaults>
</compile_context>

<pallas_src>
import functools

import jax
import jax.numpy as jnp
from jax.experimental import pallas as pl
from jax.experimental.pallas import tpu as pltpu

LANES = 128


def _log_scaled_loss_kernel(y_ref, yhat_ref, out_ref, *, total_n, tile_rows):
    c = pl.program_id(0)            # megacore-parallel chunk
    i = pl.program_id(1)            # sequential reduction step within chunk
    steps = pl.num_programs(1)

    @pl.when(i == 0)
    def _():
        out_ref[...] = jnp.zeros_like(out_ref)

    # Inputs arrive in native dtype; upcast on the VPU (free for a DMA-bound
    # kernel, halves HBM traffic for bf16 inputs).
    y = y_ref[...].astype(jnp.float32)
    yh = yhat_ref[...].astype(jnp.float32)

    loss = -jnp.log(1.0 - jnp.abs(y - yh))
    # Exactly mirror torch: NaN (log of a negative when |y-yh| > 1) -> 1e6.
    # Note: |y-yh| == 1 yields +inf in torch as well (not replaced).
    loss = jnp.where(jnp.isnan(loss), jnp.float32(1e6), loss)

    # Mask the ragged tail (and any phantom trailing tiles of the chunked
    # grid) so out-of-range elements contribute exactly 0 to the sum.
    tile_idx = c * steps + i
    row = jax.lax.broadcasted_iota(jnp.int32, loss.shape, 0)
    lane = jax.lax.broadcasted_iota(jnp.int32, loss.shape, 1)
    elem = (tile_idx * tile_rows + row) * LANES + lane
    loss = jnp.where(elem < total_n, loss, jnp.float32(0.0))

    # Fold rows -> per-lane partials (cheap VALU adds + one small sublane
    # fold); accumulate in the resident output block.  The expensive
    # cross-lane reduce happens once, in the wrapper.
    col = jnp.sum(loss, axis=0, keepdims=True)        # (1, LANES)
    out_ref[...] += col[None]                          # (1, 1, LANES)


def log_scaled_loss(y, y_hat, *, tile_rows=1024, num_chunks=2):
    """Pallas implementation of LogScaledLoss.forward. Returns a scalar f32."""
    assert y.shape == y_hat.shape, "y and y_hat must have the same shape"
    total_n = y.size
    assert total_n > 0

    flat_y = y.reshape(-1)
    flat_yh = y_hat.reshape(-1)

    # Lane-friendly (rows, 128) slab.  Pad only when the element count is not
    # already a multiple of 128 (the pad region is masked off in-kernel).
    pad = (-total_n) % LANES
    if pad:
        flat_y = jnp.pad(flat_y, (0, pad))
        flat_yh = jnp.pad(flat_yh, (0, pad))
    rows = (total_n + pad) // LANES
    y2d = flat_y.reshape(rows, LANES)
    yh2d = flat_yh.reshape(rows, LANES)

    # Block sublane extent: either the (8-multiple) tile_rows, or the full row
    # extent for small inputs (both satisfy the (8,128) block constraint).
    tr = min(tile_rows, rows)
    n_tiles = pl.cdiv(rows, tr)

    # Megacore split: nc independent chunks of the row-tile range, each
    # producing its own partial-sum vector.
    nc = min(num_chunks, n_tiles)
    steps = pl.cdiv(n_tiles, nc)

    def in_map(c, i):
        # Clamp so phantom trailing tiles (when nc*steps > n_tiles) never
        # address past the array; their contribution is masked to 0 anyway
        # (and the repeated block index lets the pipeline skip the re-DMA).
        return (jnp.minimum(c * steps + i, n_tiles - 1), 0)

    partials = pl.pallas_call(
        functools.partial(_log_scaled_loss_kernel, total_n=total_n, tile_rows=tr),
        out_shape=jax.ShapeDtypeStruct((nc, 1, LANES), jnp.float32),
        grid_spec=pltpu.PrefetchScalarGridSpec(
            num_scalar_prefetch=0,
            grid=(nc, steps),
            in_specs=[
                pl.BlockSpec((tr, LANES), in_map),
                pl.BlockSpec((tr, LANES), in_map),
            ],
            out_specs=pl.BlockSpec((1, 1, LANES), lambda c, i: (c, 0, 0)),
        ),
        compiler_params=pltpu.CompilerParams(
            dimension_semantics=("parallel", "arbitrary"),
        ),
    )(y2d, yh2d)

    # Tiny epilogue: one cross-lane reduce over nc*128 partials, then the mean.
    return jnp.sum(partials) / jnp.float32(total_n)


def _reference(y, y_hat):
    loss = -jnp.log(1.0 - jnp.abs(y.astype(jnp.float32) - y_hat.astype(jnp.float32)))
    loss = jnp.where(jnp.isnan(loss), jnp.float32(1e6), loss)
    return jnp.mean(loss)


if __name__ == "__main__":
    key = jax.random.PRNGKey(0)
    k1, k2 = jax.random.split(key)
    # Small shapes: batch=8, features=256. Ranges chosen so some |y - y_hat| > 1
    # exercises the NaN -> 1e6 branch.
    y = jax.random.uniform(k1, (8, 256), dtype=jnp.float32, minval=0.0, maxval=1.0)
    y_hat = jax.random.uniform(k2, (8, 256), dtype=jnp.float32, minval=-0.5, maxval=1.5)

    out = jax.block_until_ready(log_scaled_loss(y, y_hat))
    ref = jax.block_until_ready(_reference(y, y_hat))

    assert jnp.allclose(out, ref, rtol=1e-5, atol=1e-5), (out, ref)
    print("KERNEL_OK")
</pallas_src>

<mosaic_0001>
module attributes {stable_mosaic.version = 11 : i64} {
  func.func @_log_scaled_loss_kernel(%arg0: i32, %arg1: i32, %arg2: memref<16x128xf32, #tpu.memory_space<vmem>>, %arg3: memref<16x128xf32, #tpu.memory_space<vmem>>, %arg4: memref<1x1x128xf32, #tpu.memory_space<vmem>>) attributes {dimension_semantics = [#tpu.dimension_semantics<parallel>, #tpu.dimension_semantics<arbitrary>], iteration_bounds = array<i64: 1, 1>, scalar_prefetch = 0 : i64, scratch_operands = 0 : i64, tpu.core_type = #tpu.core_type<tc>, window_params = [{transform_indices = @transform_0, window_bounds = array<i64: 16, 128>}, {transform_indices = @transform_1, window_bounds = array<i64: 16, 128>}, {transform_indices = @transform_2, window_bounds = array<i64: 1, 1, 128>}]} {
    %c0_i32 = arith.constant 0 : i32
    %0 = arith.cmpi eq, %arg1, %c0_i32 : i32
    %1 = arith.extui %0 : i1 to i32
    %c0_i32_0 = arith.constant 0 : i32
    %2 = arith.cmpi ne, %1, %c0_i32_0 : i32
    scf.if %2 {
      %cst_14 = arith.constant 0.000000e+00 : f32
      %35 = vector.broadcast %cst_14 : f32 to vector<1x1x128xf32>
      %c0_15 = arith.constant 0 : index
      %c0_16 = arith.constant 0 : index
      %c0_17 = arith.constant 0 : index
      %36 = vector.load %arg4[%c0_15, %c0_16, %c0_17] : memref<1x1x128xf32, #tpu.memory_space<vmem>>, vector<1x1x128xf32>
      tpu.vector_store %arg4[%c0_15, %c0_16, %c0_17], %35 {strides = array<i32>} : memref<1x1x128xf32, #tpu.memory_space<vmem>>, vector<1x1x128xf32>,
    } else {
    }
    %c0 = arith.constant 0 : index
    %c0_1 = arith.constant 0 : index
    %3 = vector.load %arg2[%c0, %c0_1] : memref<16x128xf32, #tpu.memory_space<vmem>>, vector<16x128xf32>
    %c0_2 = arith.constant 0 : index
    %c0_3 = arith.constant 0 : index
    %4 = vector.load %arg3[%c0_2, %c0_3] : memref<16x128xf32, #tpu.memory_space<vmem>>, vector<16x128xf32>
    %5 = arith.subf %3, %4 : vector<16x128xf32>
    %6 = math.absf %5 : vector<16x128xf32>
    %cst = arith.constant 1.000000e+00 : f32
    %7 = vector.broadcast %cst : f32 to vector<16x128xf32>
    %8 = arith.subf %7, %6 : vector<16x128xf32>
    %9 = math.log %8 : vector<16x128xf32>
    %cst_4 = arith.constant 0.000000e+00 : f32
    %10 = vector.broadcast %cst_4 : f32 to vector<16x128xf32>
    %11 = arith.subf %10, %9 : vector<16x128xf32>
    %12 = arith.cmpf one, %11, %11 : vector<16x128xf32>
    %cst_5 = arith.constant 1.000000e+06 : f32
    %13 = vector.broadcast %cst_5 : f32 to vector<16x128xf32>
    %14 = arith.select %12, %13, %11 : vector<16x128xi1>, vector<16x128xf32>
    %c1_i32 = arith.constant 1 : i32
    %15 = arith.muli %arg0, %c1_i32 : i32
    %16 = arith.addi %15, %arg1 : i32
    %17 = tpu.iota {dimensions = array<i32: 0>} : vector<16x128xi32>
    %18 = tpu.iota {dimensions = array<i32: 1>} : vector<16x128xi32>
    %c16_i32 = arith.constant 16 : i32
    %19 = arith.muli %16, %c16_i32 : i32
    %20 = vector.broadcast %19 : i32 to vector<16x128xi32>
    %21 = arith.addi %20, %17 : vector<16x128xi32>
    %c128_i32 = arith.constant 128 : i32
    %22 = vector.broadcast %c128_i32 : i32 to vector<16x128xi32>
    %23 = arith.muli %21, %22 : vector<16x128xi32>
    %24 = arith.addi %23, %18 : vector<16x128xi32>
    %c2048_i32 = arith.constant 2048 : i32
    %25 = vector.broadcast %c2048_i32 : i32 to vector<16x128xi32>
    %26 = arith.cmpi slt, %24, %25 : vector<16x128xi32>
    %cst_6 = arith.constant 0.000000e+00 : f32
    %27 = vector.broadcast %cst_6 : f32 to vector<16x128xf32>
    %28 = arith.select %26, %14, %27 : vector<16x128xi1>, vector<16x128xf32>
    %cst_7 = arith.constant dense<0.000000e+00> : vector<128xf32>
    %29 = vector.multi_reduction <add>, %28, %cst_7 [0] : vector<16x128xf32> to vector<128xf32>
    %30 = vector.shape_cast %29 : vector<128xf32> to vector<1x128xf32>
    %c0_8 = arith.constant 0 : index
    %c0_9 = arith.constant 0 : index
    %c0_10 = arith.constant 0 : index
    %31 = vector.load %arg4[%c0_8, %c0_9, %c0_10] : memref<1x1x128xf32, #tpu.memory_space<vmem>>, vector<1x1x128xf32>
    %32 = vector.shape_cast %30 : vector<1x128xf32> to vector<1x1x128xf32>
    %33 = arith.addf %31, %32 : vector<1x1x128xf32>
    %c0_11 = arith.constant 0 : index
    %c0_12 = arith.constant 0 : index
    %c0_13 = arith.constant 0 : index
    %34 = vector.load %arg4[%c0_11, %c0_12, %c0_13] : memref<1x1x128xf32, #tpu.memory_space<vmem>>, vector<1x1x128xf32>
    tpu.vector_store %arg4[%c0_11, %c0_12, %c0_13], %33 {strides = array<i32>} : memref<1x1x128xf32, #tpu.memory_space<vmem>>, vector<1x1x128xf32>,
    return
  }
  func.func @transform_0(%arg0: i32, %arg1: i32) -> (i32, i32) {
    %c1_i32 = arith.constant 1 : i32
    %0 = arith.muli %arg0, %c1_i32 : i32
    %1 = arith.addi %0, %arg1 : i32
    %c0_i32 = arith.constant 0 : i32
    %2 = arith.minsi %1, %c0_i32 : i32
    %c0_i32_0 = arith.constant 0 : i32
    %c0_i32_1 = arith.constant 0 : i32
    return %2, %c0_i32_0 : i32, i32
  }
  func.func @transform_1(%arg0: i32, %arg1: i32) -> (i32, i32) {
    %c1_i32 = arith.constant 1 : i32
    %0 = arith.muli %arg0, %c1_i32 : i32
    %1 = arith.addi %0, %arg1 : i32
    %c0_i32 = arith.constant 0 : i32
    %2 = arith.minsi %1, %c0_i32 : i32
    %c0_i32_0 = arith.constant 0 : i32
    %c0_i32_1 = arith.constant 0 : i32
    return %2, %c0_i32_0 : i32, i32
  }
  func.func @transform_2(%arg0: i32, %arg1: i32) -> (i32, i32, i32) {
    %c0_i32 = arith.constant 0 : i32
    %c0_i32_0 = arith.constant 0 : i32
    %c0_i32_1 = arith.constant 0 : i32
    return %arg0, %c0_i32, %c0_i32_0 : i32, i32, i32
  }
}

</mosaic_0001>

<bundles_post_ra>
// kernel: tpu_custom_call.1
= control target key start
LH: loop header
LB: loop body
LE: loop exit
PB: predicated region body
PF: predicated region fallthrough
CT: control target
= control target key end

     0   :  { %7 = vsyncpa [#allocation3], 0  ;;  %s257_s0 = inlined_call_operand.hbm [shape: f32[16,128], index: 0, kind: input, shape index: {}]   ;;  %s258_s1 = inlined_call_operand.hbm [shape: f32[16,128], index: 1, kind: input, shape index: {}]   ;;  %s259_s2 = inlined_call_operand.hbm [shape: f32[1,1,128], index: 2, kind: output, shape index: {}]  }
   0x1   :  { %8 = vsyncpa [#allocation6], 0 }
   0x2   :  { %9 = vsyncpa [#allocation4], 0  ;;  %s20_s11 = sshll.u32 %s257_s0, 4  ;;  %s227_s12 = smov [#allocation2]   ;;  %s21_s11 = int_to_ptr.hbm [resolvable:$true] %s20_s11 }
   0x3   :  { %s22_s13 = sshll.u32 %s227_s12, 4  ;;  %s39_s16 = sshll.u32 %s258_s1, 4  ;;  %s23_s13 = int_to_ptr.vmem [resolvable:$true] %s22_s13  ;;  %s40_s16 = int_to_ptr.hbm [resolvable:$true] %s39_s16 }
   0x4   :  { %s228_s17 = smov 128   ;;  %s229_s18 = smov 8  }
   0x5   :  { %28 = dma.hbm_to_vmem [thread:$0]  %s21_s11, 256, %s23_s13, [#allocation3], %s228_s17, %s228_s17, %s229_s18  }
   0x6   :  { %s230_s19 = smov [#allocation5]  }
   0x7   :  { %s41_s20 = sshll.u32 %s230_s19, 4  ;;  %s42_s20 = int_to_ptr.vmem [resolvable:$true] %s41_s20 }
   0x8   :  { %47 = dma.hbm_to_vmem [thread:$0]  %s40_s16, 256, %s42_s20, [#allocation6], %s228_s17, %s228_s17, %s229_s18  }
   0x9   :  { %221 = dma.done.wait [#allocation3], 256  }
   0xa   :  { %222 = vsyncadd [#allocation3], 4294967040 }
   0xb   :  { %223 = dma.done.wait [#allocation6], 256  }
   0xc   :  { %224 = vsyncadd [#allocation6], 4294967040  ;;  %v231_v0 = vmov 0.0   ;;  %v90_v1 = vlaneseq  ;;  %v69_v2 = vld [vmem:[#allocation2] sm:$0xff]  ;;  %v70_v3 = vld [vmem:[#allocation2 + $0x8] sm:$0xff]  ;;  %s232_s0 = smov [#allocation7]  }
   0xd   :  { %68 = vst [vmem:[#allocation7] sm:$0x1] %v231_v0  ;;  %v71_v4 = vld [vmem:[#allocation5] sm:$0xff]  ;;  %v72_v5 = vld [vmem:[#allocation5 + $0x8] sm:$0xff]  ;;  %s122_s1 = sshll.u32 %s232_s0, 4  ;;  %s124_s23 = sshll.u32 %s259_s2, 4  ;;  %s123_s1 = int_to_ptr.vmem [resolvable:$true] %s122_s1  ;;  %s125_s23 = int_to_ptr.hbm [resolvable:$true] %s124_s23 }
   0xe   :  { %v73_v6 = vsub.f32 %v69_v2, %v71_v4  ;;  %v74_v7 = vsub.f32 %v70_v3, %v72_v5  ;;  %v91_v8 = vshrl.u32 %v90_v1, 7  ;;  %v94_v14 = vand.u32 127, %v90_v1 }
  0x10   :  { %v75_v9 = vand.u32 2147483647, %v73_v6  ;;  %v76_v10 = vand.u32 2147483647, %v74_v7  ;;  %v92_v13 = vadd.s32 8, %v91_v8  ;;  %v99_v15 = vmul.u32 128, %v91_v8 }
  0x12   :  { %v77_v11 = vsub.f32 1.0, %v75_v9  ;;  %v78_v12 = vsub.f32 1.0, %v76_v10  ;;  %v100_v16 = vmul.u32 128, %v92_v13  ;;  %v101_v18 = vadd.s32 %v99_v15, %v94_v14 }
  0x14   :  { %145 = vlog2.f32 %v77_v11  ;;  %v102_v21 = vadd.s32 %v100_v16, %v94_v14  ;;  %vm103_vm0 = vcmp.lt.s32.totalorder %v101_v18, 2048  ;;  %v114_v35 = vld [vmem:[#allocation7] sm:$0x1] }
  0x15   :  { %147 = vlog2.f32 %v78_v12 }
  0x16   :  { %vm104_vm2 = vcmp.lt.s32.totalorder %v102_v21, 2048 }
  0x1a   :  { %v146_v17 = vpop.eup %145 }
  0x1b   :  { %v148_v19 = vpop.eup %147  ;;  %v80_v20 = vmul.f32 0.6931472, %v146_v17 }
  0x1c   :  { %v82_v22 = vmul.f32 0.6931472, %v148_v19 }
  0x1d   :  { %v83_v23 = vsub.f32 0.0, %v80_v20 }
  0x1e   :  { %v84_v24 = vsub.f32 0.0, %v82_v22 }
  0x1f   :  { %vm85_vm1 = vcmp.ne.f32.partialorder %v83_v23, %v83_v23 }
  0x20   :  { %vm86_vm3 = vcmp.ne.f32.partialorder %v84_v24, %v84_v24  ;;  %v87_v25 = vsel %vm85_vm1, 1000000.0, %v83_v23 }
  0x21   :  { %v88_v26 = vsel %vm86_vm3, 1000000.0, %v84_v24  ;;  %v105_v27 = vsel %vm103_vm0, %v87_v25, 0.0 }
  0x22   :  { %v106_v28 = vsel %vm104_vm2, %v88_v26, 0.0 }
  0x23   :  { %v107_v29 = vadd.f32 %v106_v28, %v105_v27 }
  0x25   :  { %v108_v30 = vrot.slane %v107_v29, 4 }
  0x27   :  { %v109_v31 = vadd.f32 %v108_v30, %v107_v29 }
  0x29   :  { %v110_v32 = vrot.slane %v109_v31, 2 }
  0x2b   :  { %v111_v33 = vadd.f32 %v110_v32, %v109_v31 }
  0x2d   :  { %v112_v34 = vrot.slane %v111_v33, 1 }
  0x2f   :  { %v113_v36 = vadd.f32 %v112_v34, %v111_v33 }
  0x31   :  { %v115_v37 = vadd.f32 %v114_v35, %v113_v36 }
  0x33   :  { %116 = vst [vmem:[#allocation7] sm:$0x1] %v115_v37 }
  0x34   :  { %127 = dma.vmem_to_hbm [thread:$0]  %s123_s1, 16, %s125_s23, [#allocation4]  }
  0x35   :  { %225 = dma.done.wait [#allocation4], 16  }
  0x36   :  { %226 = vsyncadd [#allocation4], 4294967280 }
  0x37   :  { %132 = vsyncpa [#allocation3], 1 }
  0x38   :  { %133 = vsyncpa [#allocation6], 1 }
  0x39   :  { %134 = vsyncpa [#allocation4], 1 }

</bundles_post_ra>
